<compile_context>
chip_gen: v6e
topology: v6e:2x2x1
jax: 0.10.0
libtpu: 0.0.40
codegen_flags: <defaults>
</compile_context>

<pallas_src>
import functools

import numpy as np
import jax
import jax.numpy as jnp
from jax.experimental import pallas as pl
from jax.experimental.pallas import tpu as pltpu

MOTOR_DIMS = [0, 5, 6, 7, 8, 9, 10, 15]

# ----------------------------------------------------------------------------
# PGA G(3,0,1) algebra tables (GATr blade ordering).
# ----------------------------------------------------------------------------
_BLADES = [(), (0,), (1,), (2,), (3,), (0, 1), (0, 2), (0, 3), (1, 2), (1, 3),
           (2, 3), (0, 1, 2), (0, 1, 3), (0, 2, 3), (1, 2, 3), (0, 1, 2, 3)]
_IDX = {b: i for i, b in enumerate(_BLADES)}
_METRIC = {0: 0.0, 1: 1.0, 2: 1.0, 3: 1.0}   # e0^2 = 0, e1^2 = e2^2 = e3^2 = 1


def _sort_sign(seq):
    lst = list(seq)
    sign = 1
    for i in range(1, len(lst)):
        j = i
        while j > 0 and lst[j - 1] > lst[j]:
            lst[j - 1], lst[j] = lst[j], lst[j - 1]
            sign = -sign
            j -= 1
    return sign, lst


def _blade_geom(a, b):
    sign, lst = _sort_sign(list(a) + list(b))
    coef, res, i = float(sign), [], 0
    while i < len(lst):
        if i + 1 < len(lst) and lst[i] == lst[i + 1]:
            coef *= _METRIC[lst[i]]
            i += 2
        else:
            res.append(lst[i])
            i += 1
    return coef, tuple(res)


def geometric_product_tensor():
    G = np.zeros((16, 16, 16), np.float64)
    for j, bj in enumerate(_BLADES):
        for k, bk in enumerate(_BLADES):
            c, res = _blade_geom(bj, bk)
            if c != 0.0:
                G[_IDX[res], j, k] += c
    return G


def reversal_signs():
    return np.array([(-1.0) ** (len(b) * (len(b) - 1) // 2) for b in _BLADES],
                    np.float64)


def point_versor_tensor():
    # TODO(synk): gafl loads gp from a precomputed file; assumed identical to the
    # analytic G(3,0,1) geometric-product tensor in GATr blade ordering.
    gp = geometric_product_tensor()
    rev = reversal_signs()
    A = gp[11:15][:, MOTOR_DIMS, :]            # (4, 8, 16)   v * (.)
    B = gp[:, 11:15, :][:, :, MOTOR_DIMS]      # (16, 4, 8)   point * reverse(v)
    K = np.einsum('ijt,tkl->ijkl', A, B)       # (4, 8, 4, 8)
    K = K * rev[MOTOR_DIMS][None, None, None, :]
    return K


@functools.lru_cache()
def build_quadratic_coeffs():
    """Sparse symmetric quadratic forms Q[i,k] = sum_{j<=l} c * v_j * v_l."""
    K = point_versor_tensor()
    coeffs = {}
    for i in range(4):
        for k in range(4):
            terms = []
            for j in range(8):
                for l in range(j, 8):
                    c = K[i, j, k, l] + (K[i, l, k, j] if l != j else 0.0)
                    if abs(c) > 1e-12:
                        terms.append((j, l, float(c)))
            if terms:
                coeffs[(i, k)] = tuple(terms)
    return coeffs


# ----------------------------------------------------------------------------
# Pallas kernel: pure VPU elementwise on (tile_rows, 128) blocks of points.
# ----------------------------------------------------------------------------
def point_versor_kernel(x_ref, v_ref, o_ref, *, coeffs):
    # x_ref: (3, TS, 128), v_ref: (8, TS, 128), o_ref: (4, TS, 128)
    x0 = x_ref[0]
    x1 = x_ref[1]
    x2 = x_ref[2]
    v = [v_ref[j] for j in range(8)]

    # Only materialize the v_j * v_l products the sparse tensor actually touches.
    pp = {}

    def vv(j, l):
        if (j, l) not in pp:
            pp[(j, l)] = v[j] * v[l]
        return pp[(j, l)]

    def accum(acc, term, c):
        if c == 1.0:
            return term if acc is None else acc + term
        if c == -1.0:
            return -term if acc is None else acc - term
        t = term * c
        return t if acc is None else acc + t

    Q = {}
    for (i, k), terms in coeffs.items():
        acc = None
        for (j, l, c) in terms:
            acc = accum(acc, vv(j, l), c)
        Q[(i, k)] = acc

    # mv = (-x2, x1, -x0, 1):  out_i = Q[i,3] + x1*Q[i,1] - x0*Q[i,2] - x2*Q[i,0]
    for i in range(4):
        acc = Q.get((i, 3))
        q1 = Q.get((i, 1))
        if q1 is not None:
            t = x1 * q1
            acc = t if acc is None else acc + t
        q2 = Q.get((i, 2))
        if q2 is not None:
            t = x0 * q2
            acc = -t if acc is None else acc - t
        q0 = Q.get((i, 0))
        if q0 is not None:
            t = x2 * q0
            acc = -t if acc is None else acc - t
        o_ref[i, :, :] = acc if acc is not None else jnp.zeros_like(x0)


# ----------------------------------------------------------------------------
# Wrapper (layout plumbing: flatten batch dims, lane-dense transpose, padding).
# ----------------------------------------------------------------------------
def apply_point_versor(x, v, tile_rows=64):
    batch_shape = tuple(np.broadcast_shapes(x.shape[:-1], v.shape[:-1]))
    x = jnp.broadcast_to(x, batch_shape + (3,)).astype(jnp.float32)
    v = jnp.broadcast_to(v, batch_shape + (8,)).astype(jnp.float32)

    N = int(np.prod(batch_shape)) if batch_shape else 1
    R = -(-N // 128)                                   # sublane rows of 128 points
    tile_rows = max(8, min(int(tile_rows), -(-R // 8) * 8))
    R_pad = -(-R // tile_rows) * tile_rows
    Npad = R_pad * 128

    xf = jnp.pad(x.reshape(N, 3), ((0, Npad - N), (0, 0)))
    vf = jnp.pad(v.reshape(N, 8), ((0, Npad - N), (0, 0)))
    xT = xf.T.reshape(3, R_pad, 128)                   # lane axis = point index
    vT = vf.T.reshape(8, R_pad, 128)

    coeffs = build_quadratic_coeffs()

    out = pl.pallas_call(
        functools.partial(point_versor_kernel, coeffs=coeffs),
        out_shape=jax.ShapeDtypeStruct((4, R_pad, 128), jnp.float32),
        grid_spec=pltpu.PrefetchScalarGridSpec(
            num_scalar_prefetch=0,
            grid=(R_pad // tile_rows,),
            in_specs=[pl.BlockSpec((3, tile_rows, 128), lambda i: (0, i, 0)),
                      pl.BlockSpec((8, tile_rows, 128), lambda i: (0, i, 0))],
            out_specs=pl.BlockSpec((4, tile_rows, 128), lambda i: (0, i, 0)),
        ),
        compiler_params=pltpu.CompilerParams(dimension_semantics=("parallel",)),
    )(xT, vT)

    out = out.reshape(4, Npad).T[:N]
    return out.reshape(*batch_shape, 4)


def point_trafo_forward(x, T):
    return apply_point_versor(x, T)


# ----------------------------------------------------------------------------
# Pure numpy (float64) reference of the PyTorch forward pass.
# ----------------------------------------------------------------------------
def reference_apply_point_versor(x, v):
    K = point_versor_tensor()
    x = np.asarray(x, np.float64)
    v = np.asarray(v, np.float64)
    mv = np.empty(x.shape[:-1] + (4,), np.float64)
    mv[..., 3] = 1.0
    mv[..., 2] = -x[..., 0]
    mv[..., 1] = x[..., 1]
    mv[..., 0] = -x[..., 2]
    return np.einsum('ijkl,...j,...k,...l->...i', K, v, mv, v)


# ----------------------------------------------------------------------------
if __name__ == "__main__":
    key = jax.random.PRNGKey(0)
    kx, kv = jax.random.split(key)

    batch, seq = 2, 8
    x = jax.random.normal(kx, (batch, seq, 3), jnp.float32)
    T = jax.random.normal(kv, (batch, seq, 8), jnp.float32)

    out = point_trafo_forward(x, T)
    out = jax.block_until_ready(out)

    ref = reference_apply_point_versor(np.asarray(x), np.asarray(T))
    np.testing.assert_allclose(np.asarray(out, np.float64), ref,
                               rtol=1e-4, atol=1e-4)

    print("KERNEL_OK")
</pallas_src>

<mosaic_0001>
module attributes {stable_mosaic.version = 11 : i64} {
  func.func @point_versor_kernel(%arg0: i32, %arg1: memref<3x8x128xf32, #tpu.memory_space<vmem>>, %arg2: memref<8x8x128xf32, #tpu.memory_space<vmem>>, %arg3: memref<4x8x128xf32, #tpu.memory_space<vmem>>) attributes {dimension_semantics = [#tpu.dimension_semantics<parallel>], iteration_bounds = array<i64: 1>, scalar_prefetch = 0 : i64, scratch_operands = 0 : i64, tpu.core_type = #tpu.core_type<tc>, window_params = [{transform_indices = @transform_0, window_bounds = array<i64: 3, 8, 128>}, {transform_indices = @transform_1, window_bounds = array<i64: 8, 8, 128>}, {transform_indices = @transform_2, window_bounds = array<i64: 4, 8, 128>}]} {
    %c0 = arith.constant 0 : index
    %c0_0 = arith.constant 0 : index
    %c0_1 = arith.constant 0 : index
    %0 = vector.load %arg1[%c0, %c0_0, %c0_1] : memref<3x8x128xf32, #tpu.memory_space<vmem>>, vector<1x8x128xf32>
    %1 = vector.shape_cast %0 : vector<1x8x128xf32> to vector<8x128xf32>
    %c1 = arith.constant 1 : index
    %c0_2 = arith.constant 0 : index
    %c0_3 = arith.constant 0 : index
    %2 = vector.load %arg1[%c1, %c0_2, %c0_3] : memref<3x8x128xf32, #tpu.memory_space<vmem>>, vector<1x8x128xf32>
    %3 = vector.shape_cast %2 : vector<1x8x128xf32> to vector<8x128xf32>
    %c2 = arith.constant 2 : index
    %c0_4 = arith.constant 0 : index
    %c0_5 = arith.constant 0 : index
    %4 = vector.load %arg1[%c2, %c0_4, %c0_5] : memref<3x8x128xf32, #tpu.memory_space<vmem>>, vector<1x8x128xf32>
    %5 = vector.shape_cast %4 : vector<1x8x128xf32> to vector<8x128xf32>
    %c0_6 = arith.constant 0 : index
    %c0_7 = arith.constant 0 : index
    %c0_8 = arith.constant 0 : index
    %6 = vector.load %arg2[%c0_6, %c0_7, %c0_8] : memref<8x8x128xf32, #tpu.memory_space<vmem>>, vector<1x8x128xf32>
    %7 = vector.shape_cast %6 : vector<1x8x128xf32> to vector<8x128xf32>
    %c1_9 = arith.constant 1 : index
    %c0_10 = arith.constant 0 : index
    %c0_11 = arith.constant 0 : index
    %8 = vector.load %arg2[%c1_9, %c0_10, %c0_11] : memref<8x8x128xf32, #tpu.memory_space<vmem>>, vector<1x8x128xf32>
    %9 = vector.shape_cast %8 : vector<1x8x128xf32> to vector<8x128xf32>
    %c2_12 = arith.constant 2 : index
    %c0_13 = arith.constant 0 : index
    %c0_14 = arith.constant 0 : index
    %10 = vector.load %arg2[%c2_12, %c0_13, %c0_14] : memref<8x8x128xf32, #tpu.memory_space<vmem>>, vector<1x8x128xf32>
    %11 = vector.shape_cast %10 : vector<1x8x128xf32> to vector<8x128xf32>
    %c3 = arith.constant 3 : index
    %c0_15 = arith.constant 0 : index
    %c0_16 = arith.constant 0 : index
    %12 = vector.load %arg2[%c3, %c0_15, %c0_16] : memref<8x8x128xf32, #tpu.memory_space<vmem>>, vector<1x8x128xf32>
    %13 = vector.shape_cast %12 : vector<1x8x128xf32> to vector<8x128xf32>
    %c4 = arith.constant 4 : index
    %c0_17 = arith.constant 0 : index
    %c0_18 = arith.constant 0 : index
    %14 = vector.load %arg2[%c4, %c0_17, %c0_18] : memref<8x8x128xf32, #tpu.memory_space<vmem>>, vector<1x8x128xf32>
    %15 = vector.shape_cast %14 : vector<1x8x128xf32> to vector<8x128xf32>
    %c5 = arith.constant 5 : index
    %c0_19 = arith.constant 0 : index
    %c0_20 = arith.constant 0 : index
    %16 = vector.load %arg2[%c5, %c0_19, %c0_20] : memref<8x8x128xf32, #tpu.memory_space<vmem>>, vector<1x8x128xf32>
    %17 = vector.shape_cast %16 : vector<1x8x128xf32> to vector<8x128xf32>
    %c6 = arith.constant 6 : index
    %c0_21 = arith.constant 0 : index
    %c0_22 = arith.constant 0 : index
    %18 = vector.load %arg2[%c6, %c0_21, %c0_22] : memref<8x8x128xf32, #tpu.memory_space<vmem>>, vector<1x8x128xf32>
    %19 = vector.shape_cast %18 : vector<1x8x128xf32> to vector<8x128xf32>
    %c7 = arith.constant 7 : index
    %c0_23 = arith.constant 0 : index
    %c0_24 = arith.constant 0 : index
    %20 = vector.load %arg2[%c7, %c0_23, %c0_24] : memref<8x8x128xf32, #tpu.memory_space<vmem>>, vector<1x8x128xf32>
    %21 = vector.shape_cast %20 : vector<1x8x128xf32> to vector<8x128xf32>
    %22 = arith.mulf %7, %7 : vector<8x128xf32>
    %23 = arith.mulf %15, %15 : vector<8x128xf32>
    %24 = arith.addf %22, %23 : vector<8x128xf32>
    %25 = arith.mulf %17, %17 : vector<8x128xf32>
    %26 = arith.subf %24, %25 : vector<8x128xf32>
    %27 = arith.mulf %19, %19 : vector<8x128xf32>
    %28 = arith.subf %26, %27 : vector<8x128xf32>
    %29 = arith.mulf %7, %19 : vector<8x128xf32>
    %cst = arith.constant 2.000000e+00 : f32
    %30 = vector.broadcast %cst : f32 to vector<8x128xf32>
    %31 = arith.mulf %29, %30 : vector<8x128xf32>
    %32 = arith.mulf %15, %17 : vector<8x128xf32>
    %cst_25 = arith.constant 2.000000e+00 : f32
    %33 = vector.broadcast %cst_25 : f32 to vector<8x128xf32>
    %34 = arith.mulf %32, %33 : vector<8x128xf32>
    %35 = arith.addf %31, %34 : vector<8x128xf32>
    %36 = arith.mulf %7, %17 : vector<8x128xf32>
    %cst_26 = arith.constant -2.000000e+00 : f32
    %37 = vector.broadcast %cst_26 : f32 to vector<8x128xf32>
    %38 = arith.mulf %36, %37 : vector<8x128xf32>
    %39 = arith.mulf %15, %19 : vector<8x128xf32>
    %cst_27 = arith.constant 2.000000e+00 : f32
    %40 = vector.broadcast %cst_27 : f32 to vector<8x128xf32>
    %41 = arith.mulf %39, %40 : vector<8x128xf32>
    %42 = arith.addf %38, %41 : vector<8x128xf32>
    %43 = arith.mulf %7, %13 : vector<8x128xf32>
    %cst_28 = arith.constant 2.000000e+00 : f32
    %44 = vector.broadcast %cst_28 : f32 to vector<8x128xf32>
    %45 = arith.mulf %43, %44 : vector<8x128xf32>
    %46 = arith.mulf %9, %17 : vector<8x128xf32>
    %cst_29 = arith.constant -2.000000e+00 : f32
    %47 = vector.broadcast %cst_29 : f32 to vector<8x128xf32>
    %48 = arith.mulf %46, %47 : vector<8x128xf32>
    %49 = arith.addf %45, %48 : vector<8x128xf32>
    %50 = arith.mulf %11, %19 : vector<8x128xf32>
    %cst_30 = arith.constant -2.000000e+00 : f32
    %51 = vector.broadcast %cst_30 : f32 to vector<8x128xf32>
    %52 = arith.mulf %50, %51 : vector<8x128xf32>
    %53 = arith.addf %49, %52 : vector<8x128xf32>
    %54 = arith.mulf %15, %21 : vector<8x128xf32>
    %cst_31 = arith.constant 2.000000e+00 : f32
    %55 = vector.broadcast %cst_31 : f32 to vector<8x128xf32>
    %56 = arith.mulf %54, %55 : vector<8x128xf32>
    %57 = arith.addf %53, %56 : vector<8x128xf32>
    %cst_32 = arith.constant -2.000000e+00 : f32
    %58 = vector.broadcast %cst_32 : f32 to vector<8x128xf32>
    %59 = arith.mulf %29, %58 : vector<8x128xf32>
    %cst_33 = arith.constant 2.000000e+00 : f32
    %60 = vector.broadcast %cst_33 : f32 to vector<8x128xf32>
    %61 = arith.mulf %32, %60 : vector<8x128xf32>
    %62 = arith.addf %59, %61 : vector<8x128xf32>
    %63 = arith.subf %22, %23 : vector<8x128xf32>
    %64 = arith.addf %63, %25 : vector<8x128xf32>
    %65 = arith.subf %64, %27 : vector<8x128xf32>
    %66 = arith.mulf %7, %15 : vector<8x128xf32>
    %cst_34 = arith.constant 2.000000e+00 : f32
    %67 = vector.broadcast %cst_34 : f32 to vector<8x128xf32>
    %68 = arith.mulf %66, %67 : vector<8x128xf32>
    %69 = arith.mulf %17, %19 : vector<8x128xf32>
    %cst_35 = arith.constant 2.000000e+00 : f32
    %70 = vector.broadcast %cst_35 : f32 to vector<8x128xf32>
    %71 = arith.mulf %69, %70 : vector<8x128xf32>
    %72 = arith.addf %68, %71 : vector<8x128xf32>
    %73 = arith.mulf %7, %11 : vector<8x128xf32>
    %cst_36 = arith.constant -2.000000e+00 : f32
    %74 = vector.broadcast %cst_36 : f32 to vector<8x128xf32>
    %75 = arith.mulf %73, %74 : vector<8x128xf32>
    %76 = arith.mulf %9, %15 : vector<8x128xf32>
    %cst_37 = arith.constant 2.000000e+00 : f32
    %77 = vector.broadcast %cst_37 : f32 to vector<8x128xf32>
    %78 = arith.mulf %76, %77 : vector<8x128xf32>
    %79 = arith.addf %75, %78 : vector<8x128xf32>
    %80 = arith.mulf %13, %19 : vector<8x128xf32>
    %cst_38 = arith.constant -2.000000e+00 : f32
    %81 = vector.broadcast %cst_38 : f32 to vector<8x128xf32>
    %82 = arith.mulf %80, %81 : vector<8x128xf32>
    %83 = arith.addf %79, %82 : vector<8x128xf32>
    %84 = arith.mulf %17, %21 : vector<8x128xf32>
    %cst_39 = arith.constant 2.000000e+00 : f32
    %85 = vector.broadcast %cst_39 : f32 to vector<8x128xf32>
    %86 = arith.mulf %84, %85 : vector<8x128xf32>
    %87 = arith.addf %83, %86 : vector<8x128xf32>
    %cst_40 = arith.constant 2.000000e+00 : f32
    %88 = vector.broadcast %cst_40 : f32 to vector<8x128xf32>
    %89 = arith.mulf %36, %88 : vector<8x128xf32>
    %cst_41 = arith.constant 2.000000e+00 : f32
    %90 = vector.broadcast %cst_41 : f32 to vector<8x128xf32>
    %91 = arith.mulf %39, %90 : vector<8x128xf32>
    %92 = arith.addf %89, %91 : vector<8x128xf32>
    %cst_42 = arith.constant -2.000000e+00 : f32
    %93 = vector.broadcast %cst_42 : f32 to vector<8x128xf32>
    %94 = arith.mulf %66, %93 : vector<8x128xf32>
    %cst_43 = arith.constant 2.000000e+00 : f32
    %95 = vector.broadcast %cst_43 : f32 to vector<8x128xf32>
    %96 = arith.mulf %69, %95 : vector<8x128xf32>
    %97 = arith.addf %94, %96 : vector<8x128xf32>
    %98 = arith.subf %22, %23 : vector<8x128xf32>
    %99 = arith.subf %98, %25 : vector<8x128xf32>
    %100 = arith.addf %99, %27 : vector<8x128xf32>
    %101 = arith.mulf %7, %9 : vector<8x128xf32>
    %cst_44 = arith.constant 2.000000e+00 : f32
    %102 = vector.broadcast %cst_44 : f32 to vector<8x128xf32>
    %103 = arith.mulf %101, %102 : vector<8x128xf32>
    %104 = arith.mulf %11, %15 : vector<8x128xf32>
    %cst_45 = arith.constant 2.000000e+00 : f32
    %105 = vector.broadcast %cst_45 : f32 to vector<8x128xf32>
    %106 = arith.mulf %104, %105 : vector<8x128xf32>
    %107 = arith.addf %103, %106 : vector<8x128xf32>
    %108 = arith.mulf %13, %17 : vector<8x128xf32>
    %cst_46 = arith.constant 2.000000e+00 : f32
    %109 = vector.broadcast %cst_46 : f32 to vector<8x128xf32>
    %110 = arith.mulf %108, %109 : vector<8x128xf32>
    %111 = arith.addf %107, %110 : vector<8x128xf32>
    %112 = arith.mulf %19, %21 : vector<8x128xf32>
    %cst_47 = arith.constant 2.000000e+00 : f32
    %113 = vector.broadcast %cst_47 : f32 to vector<8x128xf32>
    %114 = arith.mulf %112, %113 : vector<8x128xf32>
    %115 = arith.addf %111, %114 : vector<8x128xf32>
    %116 = arith.addf %22, %23 : vector<8x128xf32>
    %117 = arith.addf %116, %25 : vector<8x128xf32>
    %118 = arith.addf %117, %27 : vector<8x128xf32>
    %119 = arith.mulf %3, %35 : vector<8x128xf32>
    %120 = arith.addf %57, %119 : vector<8x128xf32>
    %121 = arith.mulf %1, %42 : vector<8x128xf32>
    %122 = arith.subf %120, %121 : vector<8x128xf32>
    %123 = arith.mulf %5, %28 : vector<8x128xf32>
    %124 = arith.subf %122, %123 : vector<8x128xf32>
    %c0_48 = arith.constant 0 : index
    %c0_49 = arith.constant 0 : index
    %c0_50 = arith.constant 0 : index
    %125 = vector.load %arg3[%c0_48, %c0_49, %c0_50] : memref<4x8x128xf32, #tpu.memory_space<vmem>>, vector<1x8x128xf32>
    %126 = vector.shape_cast %125 : vector<1x8x128xf32> to vector<8x128xf32>
    %127 = vector.shape_cast %124 : vector<8x128xf32> to vector<1x8x128xf32>
    tpu.vector_store %arg3[%c0_48, %c0_49, %c0_50], %127 {strides = array<i32>} : memref<4x8x128xf32, #tpu.memory_space<vmem>>, vector<1x8x128xf32>,
    %128 = arith.mulf %3, %65 : vector<8x128xf32>
    %129 = arith.addf %87, %128 : vector<8x128xf32>
    %130 = arith.mulf %1, %72 : vector<8x128xf32>
    %131 = arith.subf %129, %130 : vector<8x128xf32>
    %132 = arith.mulf %5, %62 : vector<8x128xf32>
    %133 = arith.subf %131, %132 : vector<8x128xf32>
    %c1_51 = arith.constant 1 : index
    %c0_52 = arith.constant 0 : index
    %c0_53 = arith.constant 0 : index
    %134 = vector.load %arg3[%c1_51, %c0_52, %c0_53] : memref<4x8x128xf32, #tpu.memory_space<vmem>>, vector<1x8x128xf32>
    %135 = vector.shape_cast %134 : vector<1x8x128xf32> to vector<8x128xf32>
    %136 = vector.shape_cast %133 : vector<8x128xf32> to vector<1x8x128xf32>
    tpu.vector_store %arg3[%c1_51, %c0_52, %c0_53], %136 {strides = array<i32>} : memref<4x8x128xf32, #tpu.memory_space<vmem>>, vector<1x8x128xf32>,
    %137 = arith.mulf %3, %97 : vector<8x128xf32>
    %138 = arith.addf %115, %137 : vector<8x128xf32>
    %139 = arith.mulf %1, %100 : vector<8x128xf32>
    %140 = arith.subf %138, %139 : vector<8x128xf32>
    %141 = arith.mulf %5, %92 : vector<8x128xf32>
    %142 = arith.subf %140, %141 : vector<8x128xf32>
    %c2_54 = arith.constant 2 : index
    %c0_55 = arith.constant 0 : index
    %c0_56 = arith.constant 0 : index
    %143 = vector.load %arg3[%c2_54, %c0_55, %c0_56] : memref<4x8x128xf32, #tpu.memory_space<vmem>>, vector<1x8x128xf32>
    %144 = vector.shape_cast %143 : vector<1x8x128xf32> to vector<8x128xf32>
    %145 = vector.shape_cast %142 : vector<8x128xf32> to vector<1x8x128xf32>
    tpu.vector_store %arg3[%c2_54, %c0_55, %c0_56], %145 {strides = array<i32>} : memref<4x8x128xf32, #tpu.memory_space<vmem>>, vector<1x8x128xf32>,
    %c3_57 = arith.constant 3 : index
    %c0_58 = arith.constant 0 : index
    %c0_59 = arith.constant 0 : index
    %146 = vector.load %arg3[%c3_57, %c0_58, %c0_59] : memref<4x8x128xf32, #tpu.memory_space<vmem>>, vector<1x8x128xf32>
    %147 = vector.shape_cast %146 : vector<1x8x128xf32> to vector<8x128xf32>
    %148 = vector.shape_cast %118 : vector<8x128xf32> to vector<1x8x128xf32>
    tpu.vector_store %arg3[%c3_57, %c0_58, %c0_59], %148 {strides = array<i32>} : memref<4x8x128xf32, #tpu.memory_space<vmem>>, vector<1x8x128xf32>,
    return
  }
  func.func @transform_0(%arg0: i32) -> (i32, i32, i32) {
    %c0_i32 = arith.constant 0 : i32
    %c0_i32_0 = arith.constant 0 : i32
    %c0_i32_1 = arith.constant 0 : i32
    return %c0_i32, %arg0, %c0_i32_0 : i32, i32, i32
  }
  func.func @transform_1(%arg0: i32) -> (i32, i32, i32) {
    %c0_i32 = arith.constant 0 : i32
    %c0_i32_0 = arith.constant 0 : i32
    %c0_i32_1 = arith.constant 0 : i32
    return %c0_i32, %arg0, %c0_i32_0 : i32, i32, i32
  }
  func.func @transform_2(%arg0: i32) -> (i32, i32, i32) {
    %c0_i32 = arith.constant 0 : i32
    %c0_i32_0 = arith.constant 0 : i32
    %c0_i32_1 = arith.constant 0 : i32
    return %c0_i32, %arg0, %c0_i32_0 : i32, i32, i32
  }
}

</mosaic_0001>

<bundles_post_ra>
// kernel: tpu_custom_call.1
= control target key start
LH: loop header
LB: loop body
LE: loop exit
PB: predicated region body
PF: predicated region fallthrough
CT: control target
= control target key end

     0   :  { %7 = vsyncpa [#allocation3], 0  ;;  %s333_s0 = inlined_call_operand.hbm [shape: f32[3,8,128], index: 0, kind: input, shape index: {}]   ;;  %s334_s1 = inlined_call_operand.hbm [shape: f32[8,8,128], index: 1, kind: input, shape index: {}]   ;;  %s335_s2 = inlined_call_operand.hbm [shape: f32[4,8,128], index: 2, kind: output, shape index: {}]  }
   0x1   :  { %8 = vsyncpa [#allocation6], 0 }
   0x2   :  { %9 = vsyncpa [#allocation4], 0  ;;  %s242_s9 = smov [#allocation2]  }
   0x3   :  { %s15_s10 = sshll.u32 %s242_s9, 4  ;;  %s16_s10 = int_to_ptr.vmem [resolvable:$true] %s15_s10 }
   0x4   :  { %s184_s11 = scalar_lea.vmem %s16_s10, 384  ;;  %p189_p1 = scmp.lt.s32.totalorder %s16_s10, %s16_s10 }
   0x5   :  { %p185_p0 = scmp.ne.s32.totalorder %s16_s10, %s184_s11  ;;  %p190_p2 = scmp.lt.s32.totalorder %s184_s11, %s184_s11 }
   0x7   :  { %p191_p3 = por %p190_p2, %p189_p1 }
   0x9   :  { %p192_p4 = pnand %p191_p3, %p185_p0 }
   0xb   :  { %195 = shalt.err (!%p192_p4)
}
   0xc   :  { %s243_s12 = smov 128   ;;  %s244_s13 = smov 8  }
   0xd   :  { %21 = dma.hbm_to_vmem [thread:$0]  %s333_s0, 384, %s16_s10, [#allocation3], %s243_s12, %s243_s12, %s244_s13  }
   0xe   :  { %s245_s16 = smov [#allocation5]  }
   0xf   :  { %s27_s17 = sshll.u32 %s245_s16, 4  ;;  %s28_s17 = int_to_ptr.vmem [resolvable:$true] %s27_s17 }
  0x10   :  { %s204_s18 = scalar_lea.vmem %s28_s17, 1024  ;;  %p209_p6 = scmp.lt.s32.totalorder %s28_s17, %s28_s17 }
  0x11   :  { %p205_p5 = scmp.ne.s32.totalorder %s28_s17, %s204_s18  ;;  %p210_p7 = scmp.lt.s32.totalorder %s204_s18, %s204_s18 }
  0x13   :  { %p211_p8 = por %p210_p7, %p209_p6 }
  0x15   :  { %p212_p9 = pnand %p211_p8, %p205_p5 }
  0x17   :  { %215 = shalt.err (!%p212_p9)
}
  0x18   :  { %33 = dma.hbm_to_vmem [thread:$0]  %s334_s1, 1024, %s28_s17, [#allocation6], %s243_s12, %s243_s12, %s244_s13  }
  0x19   :  { %236 = dma.done.wait [#allocation3], 384  }
  0x1a   :  { %237 = vsyncadd [#allocation3], 4294966912 }
  0x1b   :  { %238 = dma.done.wait [#allocation6], 1024  }
  0x1c   :  { %239 = vsyncadd [#allocation6], 4294966272  ;;  %v45_v0 = vld [vmem:[#allocation5] sm:$0xff]  ;;  %v47_v1 = vld [vmem:[#allocation5 + $0x8] sm:$0xff]  ;;  %s246_s0 = smov [#allocation7]  }
  0x1d   :  { %v274_v2 = vld [vmem:[#allocation5 + $0x18] sm:$0xff]  ;;  %v276_v3 = vld [vmem:[#allocation5 + $0x20] sm:$0xff]  ;;  %v278_v4 = vld [vmem:[#allocation5 + $0x28] sm:$0xff]  ;;  %v60_v6 = vmul.f32 %v45_v0, %v45_v0  ;;  %v115_v52 = vmul.f32 %v47_v1, %v45_v0  ;;  %s158_s1 = sshll.u32 %s246_s0, 4  ;;  %s159_s1 = int_to_ptr.vmem [resolvable:$true] %s158_s1 }
  0x1e   :  { %v280_v5 = vld [vmem:[#allocation5 + $0x30] sm:$0xff]  ;;  %v61_v7 = vmul.f32 %v276_v3, %v276_v3  ;;  %v69_v8 = vmul.f32 %v278_v4, %v276_v3  ;;  %v287_v9 = vmul.f32 %v278_v4, %v45_v0  ;;  %v59_v10 = vld [vmem:[#allocation5 + $0x38] sm:$0xff]  ;;  %v291_v11 = vmul.f32 %v278_v4, %v278_v4  ;;  %v40_v36 = vld [vmem:[#allocation2] sm:$0xff]  ;;  %s216_s21 = scalar_lea.vmem %s159_s1, 512  ;;  %p221_p11 = scmp.lt.s32.totalorder %s159_s1, %s159_s1 }
  0x1f   :  { %v67_v12 = vmul.f32 %v280_v5, %v45_v0  ;;  %v74_v13 = vmul.f32 %v280_v5, %v276_v3  ;;  %v77_v14 = vmul.f32 %v274_v2, %v45_v0  ;;  %v49_v15 = vld [vmem:[#allocation5 + $0x10] sm:$0xff]  ;;  %v79_v19 = vmul.f32 %v278_v4, %v47_v1  ;;  %v44_v44 = vld [vmem:[#allocation2 + $0x10] sm:$0xff]  ;;  %p217_p10 = scmp.ne.s32.totalorder %s159_s1, %s216_s21  ;;  %p222_p12 = scmp.lt.s32.totalorder %s216_s21, %s216_s21 }
  0x20   :  { %v297_v16 = vadd.f32 %v61_v7, %v60_v6  ;;  %v70_v17 = vmul.f32 2.0, %v69_v8  ;;  %v73_v18 = vmul.f32 -2.0, %v287_v9  ;;  %v82_v23 = vmul.f32 %v280_v5, %v49_v15  ;;  %v42_v27 = vld [vmem:[#allocation2 + $0x8] sm:$0xff] }
  0x21   :  { %v68_v20 = vmul.f32 2.0, %v67_v12  ;;  %v301_v21 = vmul.f32 2.0, %v74_v13  ;;  %v78_v22 = vmul.f32 2.0, %v77_v14  ;;  %v80_v25 = vmul.f32 -2.0, %v79_v19  ;;  %p223_p13 = por %p222_p12, %p221_p11 }
  0x22   :  { %v64_v24 = vsub.f32 %v297_v16, %v291_v11  ;;  %v85_v26 = vmul.f32 %v59_v10, %v276_v3  ;;  %v83_v29 = vmul.f32 -2.0, %v82_v23  ;;  %v90_v30 = vsub.f32 %v60_v6, %v61_v7 }
  0x23   :  { %v71_v28 = vadd.f32 %v70_v17, %v68_v20  ;;  %v98_v31 = vmul.f32 %v49_v15, %v45_v0  ;;  %v65_v32 = vmul.f32 %v280_v5, %v280_v5  ;;  %v76_v33 = vadd.f32 %v301_v21, %v73_v18  ;;  %p224_p0 = pnand %p223_p13, %p217_p10 }
  0x24   :  { %v81_v34 = vadd.f32 %v80_v25, %v78_v22  ;;  %v86_v35 = vmul.f32 2.0, %v85_v26  ;;  %v88_v37 = vmul.f32 -2.0, %v67_v12  ;;  %v91_v38 = vadd.f32 %v90_v30, %v291_v11 }
  0x25   :  { %v93_v39 = vmul.f32 %v276_v3, %v45_v0  ;;  %v66_v40 = vsub.f32 %v64_v24, %v65_v32  ;;  %v128_v42 = vmul.f32 %v71_v28, %v42_v27  ;;  %v95_v43 = vmul.f32 %v280_v5, %v278_v4 }
  0x26   :  { %v84_v41 = vadd.f32 %v83_v29, %v81_v34  ;;  %v99_v46 = vmul.f32 -2.0, %v98_v31  ;;  %v100_v47 = vmul.f32 %v276_v3, %v47_v1  ;;  %v103_v48 = vmul.f32 %v280_v5, %v274_v2 }
  0x27   :  { %v94_v45 = vmul.f32 2.0, %v93_v39  ;;  %v130_v50 = vmul.f32 %v76_v33, %v40_v36  ;;  %v106_v51 = vmul.f32 %v59_v10, %v278_v4  ;;  %v92_v53 = vsub.f32 %v91_v38, %v65_v32 }
  0x28   :  { %v87_v49 = vadd.f32 %v86_v35, %v84_v41  ;;  %v96_v54 = vmul.f32 2.0, %v95_v43  ;;  %v101_v55 = vmul.f32 2.0, %v100_v47  ;;  %v104_v56 = vmul.f32 -2.0, %v103_v48 }
  0x29   :  { %v132_v58 = vmul.f32 %v66_v40, %v44_v44  ;;  %v111_v59 = vmul.f32 -2.0, %v93_v39  ;;  %v89_v60 = vadd.f32 %v88_v37, %v70_v17  ;;  %v107_v63 = vmul.f32 2.0, %v106_v51 }
  0x2a   :  { %v129_v57 = vadd.f32 %v128_v42, %v87_v49  ;;  %v97_v61 = vadd.f32 %v96_v54, %v94_v45  ;;  %v102_v62 = vadd.f32 %v101_v55, %v99_v46  ;;  %v113_v7 = vsub.f32 %v90_v30, %v291_v11 }
  0x2b   :  { %v116_v8 = vmul.f32 2.0, %v115_v52  ;;  %v117_v12 = vmul.f32 %v276_v3, %v49_v15  ;;  %v135_v14 = vmul.f32 %v92_v53, %v42_v27  ;;  %v120_v0 = vmul.f32 %v278_v4, %v274_v2 }
  0x2c   :  { %v131_v6 = vsub.f32 %v129_v57, %v130_v50  ;;  %v105_v13 = vadd.f32 %v104_v56, %v102_v62  ;;  %v123_v1 = vmul.f32 %v59_v10, %v280_v5  ;;  %v109_v19 = vmul.f32 2.0, %v287_v9 }
  0x2d   :  { %v112_v17 = vadd.f32 %v111_v59, %v96_v54  ;;  %v118_v20 = vmul.f32 2.0, %v117_v12  ;;  %v137_v23 = vmul.f32 %v97_v61, %v40_v36  ;;  %v121_v24 = vmul.f32 2.0, %v120_v0 }
  0x2e   :  { %v133_v18 = vsub.f32 %v131_v6, %v132_v58  ;;  %v108_v22 = vadd.f32 %v107_v63, %v105_v13  ;;  %v114_v25 = vadd.f32 %v113_v7, %v65_v32  ;;  %v124_v28 = vmul.f32 2.0, %v123_v1 }
  0x2f   :  { %v119_v26 = vadd.f32 %v118_v20, %v116_v8  ;;  %v126_v3 = vadd.f32 %v291_v11, %v297_v16  ;;  %v139_v29 = vmul.f32 %v89_v60, %v44_v44  ;;  %v110_v2 = vadd.f32 %v109_v19, %v301_v21 }
  0x30   :  { %134 = vst [vmem:[#allocation7] sm:$0xff] %v133_v18  ;;  %v136_v15 = vadd.f32 %v135_v14, %v108_v22  ;;  %v143_v5 = vmul.f32 %v112_v17, %v42_v27  ;;  %v145_v31 = vmul.f32 %v114_v25, %v40_v36 }
  0x31   :  { %v122_v4 = vadd.f32 %v121_v24, %v119_v26  ;;  %v127_v10 = vadd.f32 %v126_v3, %v65_v32  ;;  %v147_v35 = vmul.f32 %v110_v2, %v44_v44 }
  0x32   :  { %v138_v9 = vsub.f32 %v136_v15, %v137_v23 }
  0x33   :  { %v125_v30 = vadd.f32 %v124_v28, %v122_v4  ;;  %152 = vst [vmem:[#allocation7 + $0x18] sm:$0xff] %v127_v10 }
  0x34   :  { %v140_v33 = vsub.f32 %v138_v9, %v139_v29 }
  0x35   :  { %v144_v34 = vadd.f32 %v143_v5, %v125_v30 }
  0x36   :  { %142 = vst [vmem:[#allocation7 + $0x8] sm:$0xff] %v140_v33 }
  0x37   :  { %v146_v37 = vsub.f32 %v144_v34, %v145_v31 }
  0x39   :  { %v148_v38 = vsub.f32 %v146_v37, %v147_v35 }
  0x3b   :  { %150 = vst [vmem:[#allocation7 + $0x10] sm:$0xff] %v148_v38 }
  0x3c   :  { %227 = shalt.err (!%p224_p0)
}
  0x3d   :  { %164 = dma.vmem_to_hbm [thread:$0]  %s159_s1, 512, %s335_s2, [#allocation4], %s243_s12, %s243_s12, %s244_s13  }
  0x3e   :  { %240 = dma.done.wait [#allocation4], 512  }
  0x3f   :  { %241 = vsyncadd [#allocation4], 4294966784 }
  0x40   :  { %168 = vsyncpa [#allocation3], 1 }
  0x41   :  { %169 = vsyncpa [#allocation6], 1 }
  0x42   :  { %170 = vsyncpa [#allocation4], 1 }

</bundles_post_ra>
